<compile_context>
chip_gen: v7x
topology: tpu7x:2x2x1
jax: 0.10.0
libtpu: 0.0.40
codegen_flags: <defaults>
</compile_context>

<pallas_src>
import functools

import jax
import jax.numpy as jnp
from jax.experimental import pallas as pl
from jax.experimental.pallas import tpu as pltpu

# ---- model dimensions (small, deterministic, synthetic) --------------------
D = 8          # flow dimension d
DA = D // 2    # pass-through half
DB = D - DA    # transformed half
H = 32         # hidden width of the coupling MLP
BATCH = 16

LANE = 128          # TPU lane width
DEFAULT_BM = 512    # batch rows per grid step (lane axis), multiple of 128


# ---------------------------------------------------------------------------
# Kernels (feature-major tiles: rows = features/sublanes, cols = batch/lanes)
# ---------------------------------------------------------------------------
def _coupling_train_kernel(xj_ref, w1t_ref, b1t_ref, w2t_ref, b2t_ref, out_ref):
    """Training path: transform_and_compute_jacobian.

    xj_ref : (D+1, BM)  rows = [x_A | x_B | log_jacobian], cols = batch
    out_ref: (D+1, BM)  rows = [x_A | y_B | log_jacobian + sum(s)]
    """
    x_a = xj_ref[:DA, :]            # (DA, BM)
    x_b = xj_ref[DA:D, :]           # (DB, BM)
    logj = xj_ref[D:D + 1, :]       # (1, BM)

    # coupling MLP (transposed): h = relu(W1^T @ x_A + b1^T)
    h = jnp.dot(w1t_ref[...], x_a, preferred_element_type=jnp.float32) + b1t_ref[...]
    h = jnp.maximum(h, 0.0)
    st = jnp.dot(w2t_ref[...], h, preferred_element_type=jnp.float32) + b2t_ref[...]

    s = jnp.tanh(st[:DB, :])        # (DB, BM)
    t = st[DB:, :]                  # (DB, BM)
    y_b = x_b * jnp.exp(s) + t

    # direct sub-ref stores (no lane-axis concatenate)
    out_ref[:DA, :] = x_a
    out_ref[DA:D, :] = y_b
    out_ref[D:D + 1, :] = logj + jnp.sum(s, axis=0, keepdims=True)


def _coupling_eval_kernel(x_ref, w1t_ref, b1t_ref, w2t_ref, b2t_ref, out_ref):
    """Eval path: flow(x), no jacobian tracked.

    x_ref  : (D, BM)
    out_ref: (D, BM)
    """
    x_a = x_ref[:DA, :]
    x_b = x_ref[DA:D, :]

    h = jnp.dot(w1t_ref[...], x_a, preferred_element_type=jnp.float32) + b1t_ref[...]
    h = jnp.maximum(h, 0.0)
    st = jnp.dot(w2t_ref[...], h, preferred_element_type=jnp.float32) + b2t_ref[...]

    s = jnp.tanh(st[:DB, :])
    t = st[DB:, :]

    out_ref[:DA, :] = x_a
    out_ref[DA:D, :] = x_b * jnp.exp(s) + t


# ---------------------------------------------------------------------------
# Wrapper (the GeneralFlow.forward dispatch)
# ---------------------------------------------------------------------------
def _run(kernel, xj, params, feat, block_rows=DEFAULT_BM):
    w1, b1, w2, b2 = params
    b = xj.shape[0]

    # Batch tile on the lane axis: multiple of 128; don't over-pad tiny batches.
    b_pad128 = ((b + LANE - 1) // LANE) * LANE
    bm = min(block_rows, b_pad128)
    b_pad = pl.cdiv(b, bm) * bm

    # Layout plumbing to a lane-dense, feature-major slab (batch on lanes).
    xj_t = jnp.pad(xj, ((0, b_pad - b), (0, 0))).T          # (feat, b_pad)
    w1t, b1t = w1.T, b1.T                                    # (H, DA), (H, 1)
    w2t, b2t = w2.T, b2.T                                    # (2*DB, H), (2*DB, 1)

    grid = (b_pad // bm,)
    const = lambda shape: pl.BlockSpec(shape, lambda i: (0,) * len(shape))

    out_t = pl.pallas_call(
        kernel,
        out_shape=jax.ShapeDtypeStruct((feat, b_pad), jnp.float32),
        grid=grid,
        in_specs=[
            pl.BlockSpec((feat, bm), lambda i: (0, i)),      # batch-tiled input
            const(w1t.shape),                                # weights resident
            const(b1t.shape),
            const(w2t.shape),
            const(b2t.shape),
        ],
        out_specs=pl.BlockSpec((feat, bm), lambda i: (0, i)),
        compiler_params=pltpu.CompilerParams(
            dimension_semantics=("parallel",)),              # megacore on v7x
    )(xj_t, w1t, b1t, w2t, b2t)

    return out_t[:, :b].T


@functools.partial(jax.jit, static_argnames=("training",))
def general_flow_forward(xj, params, *, training=True):
    """Mirror of GeneralFlow.forward.

    training=True : xj.shape == (B, d+1), returns (B, d+1)
    training=False: xj.shape == (B, d),   returns (B, d)
    """
    if training:
        assert xj.shape[-1] == D + 1
        return _run(_coupling_train_kernel, xj, params, D + 1)
    else:
        assert xj.shape[-1] == D
        return _run(_coupling_eval_kernel, xj, params, D)


# ---------------------------------------------------------------------------
# Pure-JAX reference for correctness checking
# ---------------------------------------------------------------------------
def _reference(xj, params, training):
    w1, b1, w2, b2 = params
    if training:
        x, logj = xj[:, :D], xj[:, D:D + 1]
    else:
        x = xj
    x_a, x_b = x[:, :DA], x[:, DA:]
    h = jnp.maximum(x_a @ w1 + b1, 0.0)
    st = h @ w2 + b2
    s, t = jnp.tanh(st[:, :DB]), st[:, DB:]
    y_b = x_b * jnp.exp(s) + t
    if training:
        return jnp.concatenate([x_a, y_b, logj + jnp.sum(s, -1, keepdims=True)], -1)
    return jnp.concatenate([x_a, y_b], -1)


if __name__ == "__main__":
    key = jax.random.PRNGKey(0)
    k_w1, k_b1, k_w2, k_b2, k_x, k_j = jax.random.split(key, 6)

    # Deterministic synthetic parameters (coupling MLP).
    w1 = jax.random.normal(k_w1, (DA, H), jnp.float32) * 0.1
    b1 = jax.random.normal(k_b1, (1, H), jnp.float32) * 0.1
    w2 = jax.random.normal(k_w2, (H, 2 * DB), jnp.float32) * 0.1
    b2 = jax.random.normal(k_b2, (1, 2 * DB), jnp.float32) * 0.1
    params = (w1, b1, w2, b2)

    # Training-mode input: (B, d+1), last column = running log-inverse PDF.
    x = jax.random.uniform(k_x, (BATCH, D), jnp.float32)
    logj0 = jax.random.normal(k_j, (BATCH, 1), jnp.float32) * 0.01
    xj = jnp.concatenate([x, logj0], axis=-1)

    out_train = general_flow_forward(xj, params, training=True)
    jax.block_until_ready(out_train)
    ref_train = _reference(xj, params, True)

    out_eval = general_flow_forward(x, params, training=False)
    jax.block_until_ready(out_eval)
    ref_eval = _reference(x, params, False)

    assert out_train.shape == (BATCH, D + 1)
    assert out_eval.shape == (BATCH, D)
    assert jnp.allclose(out_train, ref_train, atol=1e-5, rtol=1e-5)
    assert jnp.allclose(out_eval, ref_eval, atol=1e-5, rtol=1e-5)

    print("KERNEL_OK")
</pallas_src>

<mosaic_0001>
module attributes {stable_mosaic.version = 11 : i64} {
  func.func @_coupling_train_kernel(%arg0: i32, %arg1: memref<9x128xf32, #tpu.memory_space<vmem>>, %arg2: memref<32x4xf32, #tpu.memory_space<vmem>>, %arg3: memref<32x1xf32, #tpu.memory_space<vmem>>, %arg4: memref<8x32xf32, #tpu.memory_space<vmem>>, %arg5: memref<8x1xf32, #tpu.memory_space<vmem>>, %arg6: memref<9x128xf32, #tpu.memory_space<vmem>>) attributes {dimension_semantics = [#tpu.dimension_semantics<parallel>], iteration_bounds = array<i64: 1>, scalar_prefetch = 0 : i64, scratch_operands = 0 : i64, tpu.core_type = #tpu.core_type<tc>, window_params = [{transform_indices = @transform_0, window_bounds = array<i64: 9, 128>}, {pipeline_mode = #tpu.pipeline_mode<synchronous>, transform_indices = @transform_1, window_bounds = array<i64: 32, 4>}, {pipeline_mode = #tpu.pipeline_mode<synchronous>, transform_indices = @transform_2, window_bounds = array<i64: 32, 1>}, {pipeline_mode = #tpu.pipeline_mode<synchronous>, transform_indices = @transform_3, window_bounds = array<i64: 8, 32>}, {pipeline_mode = #tpu.pipeline_mode<synchronous>, transform_indices = @transform_4, window_bounds = array<i64: 8, 1>}, {transform_indices = @transform_5, window_bounds = array<i64: 9, 128>}]} {
    %c0 = arith.constant 0 : index
    %c0_0 = arith.constant 0 : index
    %0 = vector.load %arg1[%c0, %c0_0] : memref<9x128xf32, #tpu.memory_space<vmem>>, vector<4x128xf32>
    %c4 = arith.constant 4 : index
    %c0_1 = arith.constant 0 : index
    %1 = vector.load %arg1[%c4, %c0_1] : memref<9x128xf32, #tpu.memory_space<vmem>>, vector<4x128xf32>
    %c8 = arith.constant 8 : index
    %c0_2 = arith.constant 0 : index
    %2 = vector.load %arg1[%c8, %c0_2] : memref<9x128xf32, #tpu.memory_space<vmem>>, vector<1x128xf32>
    %c0_3 = arith.constant 0 : index
    %c0_4 = arith.constant 0 : index
    %3 = vector.load %arg2[%c0_3, %c0_4] : memref<32x4xf32, #tpu.memory_space<vmem>>, vector<32x4xf32>
    %cst = arith.constant dense<0.000000e+00> : vector<32x128xf32>
    %4 = tpu.matmul %3, %0, %cst {dimension_numbers = #tpu.dot_dimension_numbers<[1], [0], [0], [1], [0, 0, 1, 1], [], []>} : vector<32x4xf32>, vector<4x128xf32>, vector<32x128xf32> -> vector<32x128xf32>
    %c0_5 = arith.constant 0 : index
    %c0_6 = arith.constant 0 : index
    %5 = vector.load %arg3[%c0_5, %c0_6] : memref<32x1xf32, #tpu.memory_space<vmem>>, vector<32x1xf32>
    %6 = vector.broadcast %5 : vector<32x1xf32> to vector<32x128xf32>
    %7 = arith.addf %4, %6 : vector<32x128xf32>
    %cst_7 = arith.constant 0.000000e+00 : f32
    %8 = vector.broadcast %cst_7 : f32 to vector<32x128xf32>
    %9 = arith.maximumf %7, %8 : vector<32x128xf32>
    %c0_8 = arith.constant 0 : index
    %c0_9 = arith.constant 0 : index
    %10 = vector.load %arg4[%c0_8, %c0_9] : memref<8x32xf32, #tpu.memory_space<vmem>>, vector<8x32xf32>
    %cst_10 = arith.constant dense<0.000000e+00> : vector<8x128xf32>
    %11 = tpu.matmul %10, %9, %cst_10 {dimension_numbers = #tpu.dot_dimension_numbers<[1], [0], [0], [1], [0, 0, 1, 1], [], []>} : vector<8x32xf32>, vector<32x128xf32>, vector<8x128xf32> -> vector<8x128xf32>
    %c0_11 = arith.constant 0 : index
    %c0_12 = arith.constant 0 : index
    %12 = vector.load %arg5[%c0_11, %c0_12] : memref<8x1xf32, #tpu.memory_space<vmem>>, vector<8x1xf32>
    %13 = vector.broadcast %12 : vector<8x1xf32> to vector<8x128xf32>
    %14 = arith.addf %11, %13 : vector<8x128xf32>
    %15 = vector.extract_strided_slice %14 {offsets = [0, 0], sizes = [4, 128], strides = [1, 1]} : vector<8x128xf32> to vector<4x128xf32>
    %16 = math.tanh %15 : vector<4x128xf32>
    %17 = vector.extract_strided_slice %14 {offsets = [4, 0], sizes = [4, 128], strides = [1, 1]} : vector<8x128xf32> to vector<4x128xf32>
    %18 = math.exp %16 : vector<4x128xf32>
    %19 = arith.mulf %1, %18 : vector<4x128xf32>
    %20 = arith.addf %19, %17 : vector<4x128xf32>
    %c0_13 = arith.constant 0 : index
    %c0_14 = arith.constant 0 : index
    %21 = vector.load %arg6[%c0_13, %c0_14] : memref<9x128xf32, #tpu.memory_space<vmem>>, vector<4x128xf32>
    tpu.vector_store %arg6[%c0_13, %c0_14], %0 {strides = array<i32>} : memref<9x128xf32, #tpu.memory_space<vmem>>, vector<4x128xf32>,
    %c4_15 = arith.constant 4 : index
    %c0_16 = arith.constant 0 : index
    %22 = vector.load %arg6[%c4_15, %c0_16] : memref<9x128xf32, #tpu.memory_space<vmem>>, vector<4x128xf32>
    tpu.vector_store %arg6[%c4_15, %c0_16], %20 {strides = array<i32>} : memref<9x128xf32, #tpu.memory_space<vmem>>, vector<4x128xf32>,
    %cst_17 = arith.constant dense<0.000000e+00> : vector<128xf32>
    %23 = vector.multi_reduction <add>, %16, %cst_17 [0] : vector<4x128xf32> to vector<128xf32>
    %24 = vector.shape_cast %23 : vector<128xf32> to vector<1x128xf32>
    %25 = arith.addf %2, %24 : vector<1x128xf32>
    %c8_18 = arith.constant 8 : index
    %c0_19 = arith.constant 0 : index
    %26 = vector.load %arg6[%c8_18, %c0_19] : memref<9x128xf32, #tpu.memory_space<vmem>>, vector<1x128xf32>
    tpu.vector_store %arg6[%c8_18, %c0_19], %25 {strides = array<i32>} : memref<9x128xf32, #tpu.memory_space<vmem>>, vector<1x128xf32>,
    return
  }
  func.func @transform_0(%arg0: i32) -> (i32, i32) {
    %c0_i32 = arith.constant 0 : i32
    %c0_i32_0 = arith.constant 0 : i32
    return %c0_i32, %arg0 : i32, i32
  }
  func.func @transform_1(%arg0: i32) -> (i32, i32) {
    %c0_i32 = arith.constant 0 : i32
    %c0_i32_0 = arith.constant 0 : i32
    %c0_i32_1 = arith.constant 0 : i32
    return %c0_i32, %c0_i32_0 : i32, i32
  }
  func.func @transform_2(%arg0: i32) -> (i32, i32) {
    %c0_i32 = arith.constant 0 : i32
    %c0_i32_0 = arith.constant 0 : i32
    %c0_i32_1 = arith.constant 0 : i32
    return %c0_i32, %c0_i32_0 : i32, i32
  }
  func.func @transform_3(%arg0: i32) -> (i32, i32) {
    %c0_i32 = arith.constant 0 : i32
    %c0_i32_0 = arith.constant 0 : i32
    %c0_i32_1 = arith.constant 0 : i32
    return %c0_i32, %c0_i32_0 : i32, i32
  }
  func.func @transform_4(%arg0: i32) -> (i32, i32) {
    %c0_i32 = arith.constant 0 : i32
    %c0_i32_0 = arith.constant 0 : i32
    %c0_i32_1 = arith.constant 0 : i32
    return %c0_i32, %c0_i32_0 : i32, i32
  }
  func.func @transform_5(%arg0: i32) -> (i32, i32) {
    %c0_i32 = arith.constant 0 : i32
    %c0_i32_0 = arith.constant 0 : i32
    return %c0_i32, %arg0 : i32, i32
  }
}

</mosaic_0001>

<bundles_post_ra>
// kernel: general_flow_forward.1
= control target key start
LH: loop header
LB: loop body
LE: loop exit
PB: predicated region body
PF: predicated region fallthrough
CT: control target
= control target key end

     0   :  { %vm64_vm0 = vcmask 1043456   ;;  %vm51_vm1 = vcmask 31744   ;;  %v312_v1 = vmov 0   ;;  %v313_v11 = vmov 0.0|0.0   ;;  %s401_s0 = inlined_call_operand.vmem [shape: f32[9,128], index: 0, kind: input, shape index: {}]   ;;  %s402_s1 = inlined_call_operand.vmem [shape: f32[32,4], index: 1, kind: input, shape index: {}]   ;;  %s403_s2 = inlined_call_operand.vmem [shape: f32[32,1], index: 2, kind: input, shape index: {}]   ;;  %s404_s5 = inlined_call_operand.vmem [shape: f32[9,128], index: 5, kind: output, shape index: {}]   ;;  %s405_s4 = inlined_call_operand.vmem [shape: f32[8,1], index: 4, kind: input, shape index: {}]   ;;  %s406_s3 = inlined_call_operand.vmem [shape: f32[8,32], index: 3, kind: input, shape index: {}]  }
   0x1   :  { %v20_v0 = vld [vmem:[%s401_s0] sm:$0xf]  ;;  %306 = vset.pattern.permute.xlu0 %v312_v1  ;;  %307 = vset.pattern.permute.xlu1 %v312_v1  ;;  %v24_v3 = vld [vmem:[%s402_s1 + $0x8] sm:$0xff]  ;;  %v25_v4 = vld [vmem:[%s402_s1 + $0x10] sm:$0xff]  ;;  %vm314_vm2 = vmmov 0   ;;  %v315_v12 = vmov 0.0  }
   0x2   :  { %277 = vmatprep.subr.msk.mxu0 %vm64_vm0, %v20_v0  ;;  %246 = vst [vmem:[%s404_s5] sm:$0xf] %v20_v0  ;;  %v23_v2 = vld [vmem:[%s402_s1] sm:$0xff]  ;;  %v29_v6 = vld [vmem:[%s403_s2 + $0x10] sm:$0xff]  ;;  %v26_v7 = vld [vmem:[%s402_s1 + $0x18] sm:$0xff]  ;;  %296 = vmatprep.subr.bf16.mxu1 %v313_v11  ;;  %vm164_vm3 = vcmask 261120  }
   0x3   :  { %278 = vmatpush3.msk.msra.mxu0 %vm64_vm0, %v20_v0  ;;  %279 = vmatprep.mubr.msk.f32.mxu0 %vm51_vm1, %v23_v2  ;;  %v27_v5 = vld [vmem:[%s403_s2] sm:$0xff]  ;;  %v28_v8 = vld [vmem:[%s403_s2 + $0x8] sm:$0xff]  ;;  %v30_v9 = vld [vmem:[%s403_s2 + $0x18] sm:$0xff] }
   0x4   :  { %280 = vmatmul.mubr.msk.f32.vlgmr.msra.gmra.mrb[0].mxu0 %vm51_vm1, %v24_v3  ;;  %33 = vperm.xlu0 %306, %v27_v5   ;;  %v158_v10 = vld [vmem:[%s405_s4] sm:$0xff]  ;;  %v22_v45 = vld [vmem:[%s401_s0 + $0x8] sm:$0x1] }
   0x5   :  { %282 = vmatprep.mubr.msk.f32.mxu0 %vm51_vm1, %v25_v4  ;;  %43 = vperm.xlu1 %307, %v29_v6   ;;  %v157_v31 = vld [vmem:[%s406_s3] sm:$0xff] }
   0x6   :  { %293 = vmatprep.mubr.msk.f32.mxu1 %vm314_vm2, %v315_v12  ;;  %v21_v44 = vld [vmem:[%s401_s0 + $0x4] sm:$0xf] }
   0x8   :  { %283 = vmatmul.mubr.msk.f32.gmra.mrb[2].mxu0 %vm51_vm1, %v26_v7  ;;  %38 = vperm.xlu0 %306, %v28_v8  }
   0x9   :  { %48 = vperm.xlu1 %307, %v30_v9  }
   0xc   :  { %161 = vperm.xlu0 %306, %v158_v10  }
  0x83   :  { %v34_v13 = vpop.permute.xlu0 %33 }
  0x84   :  { %v44_v14 = vpop.permute.xlu1 %43 }
  0x87   :  { %v39_v15 = vpop.permute.xlu0 %38 }
  0x88   :  { %v49_v21 = vpop.permute.xlu1 %48 }
  0x8b   :  { %v162_v32 = vpop.permute.xlu0 %161 }
  0xd7   :  { %v281_v16 = vpop.f32.mrb[0].mxu0 }
  0xd8   :  { %v140_v17 = vadd.f32 %v281_v16, %v39_v15  ;;  %v134_v18 = vpop.f32.mrb[1].mxu0 }
  0xd9   :  { %v135_v19 = vadd.f32 %v134_v18, %v34_v13 }
  0xda   :  { %v154_v20 = vmax.f32 %v140_v17, 0.0 }
  0xdb   :  { %v153_v22 = vmax.f32 %v135_v19, 0.0  ;;  %v284_v23 = vpop.f32.mrb[2].mxu0 }
  0xdc   :  { %v150_v24 = vadd.f32 %v284_v23, %v49_v21  ;;  %v144_v25 = vpop.f32.mrb[3].mxu0 }
  0xdd   :  { %v145_v26 = vadd.f32 %v144_v25, %v44_v14  ;;  %v297_v27 = vpack.c.bf16 %v154_v20, %v153_v22 }
  0xde   :  { %v156_v28 = vmax.f32 %v150_v24, 0.0 }
  0xdf   :  { %v155_v29 = vmax.f32 %v145_v26, 0.0  ;;  %298 = vmatpush3.bf16.msra.mxu1 %v297_v27 }
  0xe0   :  { %299 = vmatprep.subr.bf16.mxu1 %v313_v11 }
  0xe1   :  { %v300_v30 = vpack.c.bf16 %v156_v28, %v155_v29 }
  0xe3   :  { %301 = vmatpush3.bf16.msra.mxu1 %v300_v30 }
  0xe6   :  { %294 = vmatmul.mubr.msk.f32.vlgmr.msra.gmra.mrb[0].mxu1 %vm164_vm3, %v157_v31 }
 0x1b9   :  { %v234_v33 = vpop.f32.mrb[0].mxu1 }
 0x1ba   :  { %v235_v34 = vadd.f32 %v234_v33, %v162_v32  ;;  %v295_v35 = vpop.f32.mrb[1].mxu1 }
 0x1bc   :  { %308 = vtanh.f32 %v235_v34  ;;  %v243_v49 = vrot.slane %v235_v34, 4 }
 0x1c6   :  { %v309_v36 = vpop.eup %308 }
 0x1c7   :  { %v239_v37 = vmul.f32 1.442695, %v309_v36  ;;  %v248_v38 = vsel %vm64_vm0, %v309_v36, 0.0 }
 0x1c8   :  { %v249_v39 = vrot.slane %v248_v38, 4 }
 0x1c9   :  { %310 = vpow2.f32 %v239_v37 }
 0x1ca   :  { %v250_v40 = vadd.f32 %v249_v39, %v248_v38 }
 0x1cc   :  { %v251_v41 = vrot.slane %v250_v40, 2 }
 0x1ce   :  { %v252_v42 = vadd.f32 %v251_v41, %v250_v40 }
 0x1d0   :  { %v253_v43 = vrot.slane %v252_v42, 1 }
 0x1d2   :  { %v254_v46 = vadd.f32 %v253_v43, %v252_v42 }
 0x1d3   :  { %v311_v47 = vpop.eup %310 }
 0x1d4   :  { %v241_v48 = vmul.f32 %v311_v47, %v21_v44  ;;  %v255_v50 = vadd.f32 %v254_v46, %v22_v45 }
 0x1d6   :  { %v245_v51 = vadd.f32 %v243_v49, %v241_v48  ;;  %256 = vst [vmem:[%s404_s5 + $0x8] sm:$0x1] %v255_v50 }
 0x1d8   :  { %247 = vst [vmem:[%s404_s5 + $0x4] sm:$0xf] %v245_v51 }

</bundles_post_ra>
